<compile_context>
chip_gen: v7x
topology: tpu7x:2x2x1
jax: 0.10.0
libtpu: 0.0.40
codegen_flags: <defaults>
</compile_context>

<pallas_src>
import jax
import jax.numpy as jnp
from jax.experimental import pallas as pl
from jax.experimental.pallas import tpu as pltpu


def _rnn_classifier_kernel(toks_ref, embp_ref, whh_ref, wc_ref, bc_ref, out_ref):
    """One-shot input projection + tanh-RNN recurrence + final linear."""
    toks = toks_ref[...]            # (S*Bp, 1) int32, time-major flattened
    embp = embp_ref[...]            # (Vp, D)  f32 == emb @ W_ih^T + (b_ih + b_hh)
    whh = whh_ref[...]              # (D, D)   f32 (pre-transposed: h @ whh)
    wc = wc_ref[...]                # (D, Cp)  f32 (zero-padded lanes)
    bc = bc_ref[...]                # (1, Cp)  f32

    SB = toks.shape[0]
    Vp, D = embp.shape
    Bp = out_ref.shape[0]
    S = SB // Bp

    # All timesteps' input projections in a single MXU op (off the serial chain).
    vocab_iota = jax.lax.broadcasted_iota(jnp.int32, (SB, Vp), dimension=1)
    onehot = (toks == vocab_iota).astype(jnp.float32)                  # (S*Bp, Vp)
    x_proj = jnp.dot(onehot, embp, preferred_element_type=jnp.float32)  # (S*Bp, D)

    # Serial recurrence: only one (Bp,D)@(D,D) matmul per step remains on the chain.
    h = jnp.zeros((Bp, D), jnp.float32)
    for t in range(S):
        x_t = x_proj[t * Bp:(t + 1) * Bp, :]   # contiguous, sublane-aligned static slice
        h = jnp.tanh(x_t + jnp.dot(h, whh, preferred_element_type=jnp.float32))

    logits = jnp.dot(h, wc, preferred_element_type=jnp.float32) + bc    # (Bp, Cp)
    out_ref[...] = logits.astype(out_ref.dtype)


@jax.jit
def rnn_classifier_forward(tokens, emb, w_ih, w_hh, b_ih, b_hh, w_cls, b_cls):
    """Pallas forward: returns logits of shape (B, sentence_length + 1)."""
    B, S = tokens.shape
    V, D = emb.shape
    C = w_cls.shape[0]

    Bp = max(8, ((B + 7) // 8) * 8)          # sublane-dense batch
    Vp = ((V + 7) // 8) * 8                  # sublane-dense vocab rows
    Cp = max(128, ((C + 127) // 128) * 128)  # lane-dense classifier output

    # --- one-time weight prep (plain JAX glue, outside the recurrence) ---
    # Fold emb @ W_ih^T and the RNN bias.  Row 0 of emb is zero, so padding_idx=0
    # still contributes exactly (b_ih + b_hh), matching nn.RNN's cell.
    emb_proj = jnp.dot(emb.astype(jnp.float32), w_ih.T.astype(jnp.float32),
                       precision=jax.lax.Precision.HIGHEST)              # (V, D)
    emb_proj = emb_proj + (b_ih + b_hh).reshape(1, D).astype(jnp.float32)
    emb_proj = jnp.pad(emb_proj, ((0, Vp - V), (0, 0)))                  # (Vp, D)
    whh_t = w_hh.T.astype(jnp.float32)                                   # (D, D)
    wc_pad = jnp.pad(w_cls.T.astype(jnp.float32), ((0, 0), (0, Cp - C)))  # (D, Cp)
    bc_pad = jnp.pad(b_cls.reshape(1, C).astype(jnp.float32),
                     ((0, 0), (0, Cp - C)))                              # (1, Cp)

    # Pad batch with token 0 (zero embedding row) and flatten time-major so the
    # kernel's per-step slice of x_proj is contiguous.
    toks = jnp.pad(tokens.astype(jnp.int32), ((0, Bp - B), (0, 0)))      # (Bp, S)
    toks_tm = toks.T.reshape(S * Bp, 1)                                  # (S*Bp, 1)

    vmem = pl.BlockSpec(memory_space=pltpu.MemorySpace.VMEM)
    out = pl.pallas_call(
        _rnn_classifier_kernel,
        out_shape=jax.ShapeDtypeStruct((Bp, Cp), jnp.float32),
        in_specs=[vmem] * 5,
        out_specs=vmem,
    )(toks_tm, emb_proj, whh_t, wc_pad, bc_pad)

    return out[:B, :C]


def cross_entropy_loss(logits, y):
    # Matches nn.CrossEntropyLoss (mean reduction) — tiny glue op, plain JAX.
    logz = jax.nn.logsumexp(logits, axis=-1)
    picked = jnp.take_along_axis(logits, y[:, None].astype(jnp.int32), axis=-1)[:, 0]
    return jnp.mean(logz - picked)


def init_params(key, vocab_size, vector_dim, sentence_length):
    """Deterministic synthetic parameters (shapes match the PyTorch module)."""
    D = vector_dim
    C = sentence_length + 1
    k = jax.random.split(key, 7)
    scale = 1.0 / jnp.sqrt(jnp.float32(D))

    emb = 0.1 * jax.random.normal(k[0], (vocab_size, D), jnp.float32)
    emb = emb.at[0].set(0.0)  # padding_idx=0 row is zeros

    w_ih = jax.random.uniform(k[1], (D, D), jnp.float32, -scale, scale)
    w_hh = jax.random.uniform(k[2], (D, D), jnp.float32, -scale, scale)
    b_ih = jax.random.uniform(k[3], (D,), jnp.float32, -scale, scale)
    b_hh = jax.random.uniform(k[4], (D,), jnp.float32, -scale, scale)

    w_cls = jax.random.uniform(k[5], (C, D), jnp.float32, -scale, scale)
    b_cls = jax.random.uniform(k[6], (C,), jnp.float32, -scale, scale)
    return emb, w_ih, w_hh, b_ih, b_hh, w_cls, b_cls


if __name__ == "__main__":
    vector_dim = 32
    sentence_length = 8
    vocab_size = 30
    batch = 2

    key = jax.random.PRNGKey(0)
    kp, kx, ky = jax.random.split(key, 3)

    params = init_params(kp, vocab_size, vector_dim, sentence_length)
    tokens = jax.random.randint(kx, (batch, sentence_length), 0, vocab_size, jnp.int32)
    y = jax.random.randint(ky, (batch,), 0, sentence_length + 1, jnp.int32)

    logits = rnn_classifier_forward(tokens, *params)   # forward(x) path -> (B, S+1)
    logits = jax.block_until_ready(logits)

    loss = jax.block_until_ready(cross_entropy_loss(logits, y))  # forward(x, y) path

    assert logits.shape == (batch, sentence_length + 1)
    assert jnp.isfinite(logits).all() and jnp.isfinite(loss)
    print("KERNEL_OK")
</pallas_src>

<mosaic_0001>
module attributes {stable_mosaic.version = 11 : i64} {
  func.func @_rnn_classifier_kernel(%arg0: memref<64x1xi32, #tpu.memory_space<vmem>>, %arg1: memref<32x32xf32, #tpu.memory_space<vmem>>, %arg2: memref<32x32xf32, #tpu.memory_space<vmem>>, %arg3: memref<32x128xf32, #tpu.memory_space<vmem>>, %arg4: memref<1x128xf32, #tpu.memory_space<vmem>>, %arg5: memref<8x128xf32, #tpu.memory_space<vmem>>) attributes {dimension_semantics = [], scalar_prefetch = 0 : i64, scratch_operands = 0 : i64, tpu.core_type = #tpu.core_type<tc>} {
    %c0 = arith.constant 0 : index
    %c0_0 = arith.constant 0 : index
    %0 = vector.load %arg0[%c0, %c0_0] : memref<64x1xi32, #tpu.memory_space<vmem>>, vector<64x1xi32>
    %c0_1 = arith.constant 0 : index
    %c0_2 = arith.constant 0 : index
    %1 = vector.load %arg1[%c0_1, %c0_2] : memref<32x32xf32, #tpu.memory_space<vmem>>, vector<32x32xf32>
    %c0_3 = arith.constant 0 : index
    %c0_4 = arith.constant 0 : index
    %2 = vector.load %arg2[%c0_3, %c0_4] : memref<32x32xf32, #tpu.memory_space<vmem>>, vector<32x32xf32>
    %c0_5 = arith.constant 0 : index
    %c0_6 = arith.constant 0 : index
    %3 = vector.load %arg3[%c0_5, %c0_6] : memref<32x128xf32, #tpu.memory_space<vmem>>, vector<32x128xf32>
    %c0_7 = arith.constant 0 : index
    %c0_8 = arith.constant 0 : index
    %4 = vector.load %arg4[%c0_7, %c0_8] : memref<1x128xf32, #tpu.memory_space<vmem>>, vector<1x128xf32>
    %5 = tpu.iota {dimensions = array<i32: 1>} : vector<64x32xi32>
    %6 = vector.broadcast %0 : vector<64x1xi32> to vector<64x32xi32>
    %7 = arith.cmpi eq, %6, %5 : vector<64x32xi32>
    %8 = arith.extui %7 : vector<64x32xi1> to vector<64x32xi32>
    %9 = arith.sitofp %8 : vector<64x32xi32> to vector<64x32xf32>
    %cst = arith.constant dense<0.000000e+00> : vector<64x32xf32>
    %10 = tpu.matmul %9, %1, %cst {dimension_numbers = #tpu.dot_dimension_numbers<[1], [0], [0], [1], [0, 0, 1, 1], [], []>} : vector<64x32xf32>, vector<32x32xf32>, vector<64x32xf32> -> vector<64x32xf32>
    %cst_9 = arith.constant 0.000000e+00 : f32
    %11 = vector.broadcast %cst_9 : f32 to vector<8x32xf32>
    %12 = vector.extract_strided_slice %10 {offsets = [0, 0], sizes = [8, 32], strides = [1, 1]} : vector<64x32xf32> to vector<8x32xf32>
    %cst_10 = arith.constant dense<0.000000e+00> : vector<8x32xf32>
    %13 = tpu.matmul %11, %2, %cst_10 {dimension_numbers = #tpu.dot_dimension_numbers<[1], [0], [0], [1], [0, 0, 1, 1], [], []>} : vector<8x32xf32>, vector<32x32xf32>, vector<8x32xf32> -> vector<8x32xf32>
    %14 = arith.addf %12, %13 : vector<8x32xf32>
    %15 = math.tanh %14 : vector<8x32xf32>
    %16 = vector.extract_strided_slice %10 {offsets = [8, 0], sizes = [8, 32], strides = [1, 1]} : vector<64x32xf32> to vector<8x32xf32>
    %cst_11 = arith.constant dense<0.000000e+00> : vector<8x32xf32>
    %17 = tpu.matmul %15, %2, %cst_11 {dimension_numbers = #tpu.dot_dimension_numbers<[1], [0], [0], [1], [0, 0, 1, 1], [], []>} : vector<8x32xf32>, vector<32x32xf32>, vector<8x32xf32> -> vector<8x32xf32>
    %18 = arith.addf %16, %17 : vector<8x32xf32>
    %19 = math.tanh %18 : vector<8x32xf32>
    %20 = vector.extract_strided_slice %10 {offsets = [16, 0], sizes = [8, 32], strides = [1, 1]} : vector<64x32xf32> to vector<8x32xf32>
    %cst_12 = arith.constant dense<0.000000e+00> : vector<8x32xf32>
    %21 = tpu.matmul %19, %2, %cst_12 {dimension_numbers = #tpu.dot_dimension_numbers<[1], [0], [0], [1], [0, 0, 1, 1], [], []>} : vector<8x32xf32>, vector<32x32xf32>, vector<8x32xf32> -> vector<8x32xf32>
    %22 = arith.addf %20, %21 : vector<8x32xf32>
    %23 = math.tanh %22 : vector<8x32xf32>
    %24 = vector.extract_strided_slice %10 {offsets = [24, 0], sizes = [8, 32], strides = [1, 1]} : vector<64x32xf32> to vector<8x32xf32>
    %cst_13 = arith.constant dense<0.000000e+00> : vector<8x32xf32>
    %25 = tpu.matmul %23, %2, %cst_13 {dimension_numbers = #tpu.dot_dimension_numbers<[1], [0], [0], [1], [0, 0, 1, 1], [], []>} : vector<8x32xf32>, vector<32x32xf32>, vector<8x32xf32> -> vector<8x32xf32>
    %26 = arith.addf %24, %25 : vector<8x32xf32>
    %27 = math.tanh %26 : vector<8x32xf32>
    %28 = vector.extract_strided_slice %10 {offsets = [32, 0], sizes = [8, 32], strides = [1, 1]} : vector<64x32xf32> to vector<8x32xf32>
    %cst_14 = arith.constant dense<0.000000e+00> : vector<8x32xf32>
    %29 = tpu.matmul %27, %2, %cst_14 {dimension_numbers = #tpu.dot_dimension_numbers<[1], [0], [0], [1], [0, 0, 1, 1], [], []>} : vector<8x32xf32>, vector<32x32xf32>, vector<8x32xf32> -> vector<8x32xf32>
    %30 = arith.addf %28, %29 : vector<8x32xf32>
    %31 = math.tanh %30 : vector<8x32xf32>
    %32 = vector.extract_strided_slice %10 {offsets = [40, 0], sizes = [8, 32], strides = [1, 1]} : vector<64x32xf32> to vector<8x32xf32>
    %cst_15 = arith.constant dense<0.000000e+00> : vector<8x32xf32>
    %33 = tpu.matmul %31, %2, %cst_15 {dimension_numbers = #tpu.dot_dimension_numbers<[1], [0], [0], [1], [0, 0, 1, 1], [], []>} : vector<8x32xf32>, vector<32x32xf32>, vector<8x32xf32> -> vector<8x32xf32>
    %34 = arith.addf %32, %33 : vector<8x32xf32>
    %35 = math.tanh %34 : vector<8x32xf32>
    %36 = vector.extract_strided_slice %10 {offsets = [48, 0], sizes = [8, 32], strides = [1, 1]} : vector<64x32xf32> to vector<8x32xf32>
    %cst_16 = arith.constant dense<0.000000e+00> : vector<8x32xf32>
    %37 = tpu.matmul %35, %2, %cst_16 {dimension_numbers = #tpu.dot_dimension_numbers<[1], [0], [0], [1], [0, 0, 1, 1], [], []>} : vector<8x32xf32>, vector<32x32xf32>, vector<8x32xf32> -> vector<8x32xf32>
    %38 = arith.addf %36, %37 : vector<8x32xf32>
    %39 = math.tanh %38 : vector<8x32xf32>
    %40 = vector.extract_strided_slice %10 {offsets = [56, 0], sizes = [8, 32], strides = [1, 1]} : vector<64x32xf32> to vector<8x32xf32>
    %cst_17 = arith.constant dense<0.000000e+00> : vector<8x32xf32>
    %41 = tpu.matmul %39, %2, %cst_17 {dimension_numbers = #tpu.dot_dimension_numbers<[1], [0], [0], [1], [0, 0, 1, 1], [], []>} : vector<8x32xf32>, vector<32x32xf32>, vector<8x32xf32> -> vector<8x32xf32>
    %42 = arith.addf %40, %41 : vector<8x32xf32>
    %43 = math.tanh %42 : vector<8x32xf32>
    %cst_18 = arith.constant dense<0.000000e+00> : vector<8x128xf32>
    %44 = tpu.matmul %43, %3, %cst_18 {dimension_numbers = #tpu.dot_dimension_numbers<[1], [0], [0], [1], [0, 0, 1, 1], [], []>} : vector<8x32xf32>, vector<32x128xf32>, vector<8x128xf32> -> vector<8x128xf32>
    %45 = vector.broadcast %4 : vector<1x128xf32> to vector<8x128xf32>
    %46 = arith.addf %44, %45 : vector<8x128xf32>
    %c0_19 = arith.constant 0 : index
    %c0_20 = arith.constant 0 : index
    %47 = vector.load %arg5[%c0_19, %c0_20] : memref<8x128xf32, #tpu.memory_space<vmem>>, vector<8x128xf32>
    tpu.vector_store %arg5[%c0_19, %c0_20], %46 {strides = array<i32>} : memref<8x128xf32, #tpu.memory_space<vmem>>, vector<8x128xf32>,
    return
  }
}

</mosaic_0001>

<bundles_post_ra>
// kernel: rnn_classifier_forward.1
= control target key start
LH: loop header
LB: loop body
LE: loop exit
PB: predicated region body
PF: predicated region fallthrough
CT: control target
= control target key end

     0   :  { %v1190_v0 = vmov 0   ;;  %v1191_v7 = vmov 0.0|0.0   ;;  %vm1192_vm0 = vmmov 0   ;;  %v1193_v20 = vmov 0.0   ;;  %s1374_s0 = inlined_call_operand.vmem [shape: s32[64,1], index: 0, kind: input, shape index: {}]   ;;  %s1375_s1 = inlined_call_operand.vmem [shape: f32[32,32], index: 1, kind: input, shape index: {}]   ;;  %s1376_s2 = inlined_call_operand.vmem [shape: f32[32,32], index: 2, kind: input, shape index: {}]   ;;  %s1377_s3 = inlined_call_operand.vmem [shape: f32[32,128], index: 3, kind: input, shape index: {}]   ;;  %s1378_s4 = inlined_call_operand.vmem [shape: f32[1,128], index: 4, kind: input, shape index: {}]   ;;  %s1379_s5 = inlined_call_operand.vmem [shape: f32[8,128], index: 5, kind: output, shape index: {}]  }
   0x1   :  { %1172 = vset.pattern.permute.xlu0 %v1190_v0  ;;  %v20_v1 = vld [vmem:[%s1374_s0] sm:$0xff]  ;;  %1173 = vset.pattern.permute.xlu1 %v1190_v0  ;;  %v22_v2 = vld [vmem:[%s1374_s0 + $0x10] sm:$0xff]  ;;  %v21_v3 = vld [vmem:[%s1374_s0 + $0x8] sm:$0xff]  ;;  %v41_v22 = vlaneseq  ;;  %vm91_vm1 = vcmask 261120  }
   0x2   :  { %44 = vperm.xlu0 %1172, %v20_v1   ;;  %50 = vperm.xlu1 %1173, %v22_v2   ;;  %v23_v4 = vld [vmem:[%s1374_s0 + $0x18] sm:$0xff]  ;;  %v28_v5 = vld [vmem:[%s1375_s1] sm:$0xff]  ;;  %v29_v6 = vld [vmem:[%s1375_s1 + $0x8] sm:$0xff] }
   0x3   :  { %1114 = vmatprep.subr.bf16.mxu1 %v1191_v7  ;;  %v1106_v8 = vpack.c.bf16 %v29_v6, %v28_v5  ;;  %v32_v9 = vld [vmem:[%s1376_s2] sm:$0xff]  ;;  %v33_v10 = vld [vmem:[%s1376_s2 + $0x8] sm:$0xff]  ;;  %v30_v11 = vld [vmem:[%s1375_s1 + $0x10] sm:$0xff]  ;;  %1015 = vmatprep.mubr.msk.f32.mxu1 %vm1192_vm0, %v1193_v20  ;;  %v42_v23 = vand.u32 127, %v41_v22 }
   0x4   :  { %v1252_v12 = vpack.c.bf16 %v33_v10, %v32_v9  ;;  %v31_v13 = vld [vmem:[%s1375_s1 + $0x18] sm:$0xff]  ;;  %v34_v14 = vld [vmem:[%s1376_s2 + $0x10] sm:$0xff]  ;;  %v24_v17 = vld [vmem:[%s1374_s0 + $0x20] sm:$0xff] }
   0x5   :  { %v35_v15 = vld [vmem:[%s1376_s2 + $0x18] sm:$0xff]  ;;  %v1110_v16 = vpack.c.bf16 %v31_v13, %v30_v11  ;;  %v25_v18 = vld [vmem:[%s1374_s0 + $0x28] sm:$0xff]  ;;  %1107 = vmatprep.subr.bf16.mxu0 %v1106_v8  ;;  %v26_v21 = vld [vmem:[%s1374_s0 + $0x30] sm:$0xff] }
   0x6   :  { %47 = vperm.xlu0 %1172, %v21_v3   ;;  %53 = vperm.xlu1 %1173, %v23_v4   ;;  %v1270_v19 = vpack.c.bf16 %v35_v15, %v34_v14  ;;  %v27_v40 = vld [vmem:[%s1374_s0 + $0x38] sm:$0xff]  ;;  %v36_v14 = vld [vmem:[%s1377_s3] sm:$0xff]  ;;  %v37_v15 = vld [vmem:[%s1377_s3 + $0x8] sm:$0xff] }
   0x7   :  { %1116 = vmatpush3.bf16.msra.mxu1 %v1252_v12  ;;  %1109 = vmatpush3.bf16.msra.mxu0 %v1106_v8 }
   0x8   :  { %1117 = vmatprep.subr.bf16.mxu1 %v1191_v7  ;;  %1111 = vmatprep.subr.bf16.mxu0 %v1110_v16 }
   0xa   :  { %56 = vperm.xlu0 %1172, %v24_v17   ;;  %59 = vperm.xlu1 %1173, %v25_v18   ;;  %v1163_v17 = vpack.c.bf16 %v37_v15, %v36_v14  ;;  %v39_v18 = vld [vmem:[%s1377_s3 + $0x18] sm:$0xff] }
   0xb   :  { %1119 = vmatpush3.bf16.msra.mxu1 %v1270_v19  ;;  %1113 = vmatpush3.bf16.msra.mxu0 %v1110_v16  ;;  %v38_v16 = vld [vmem:[%s1377_s3 + $0x10] sm:$0xff] }
   0xc   :  { %1120 = vmatprep.subr.bf16.mxu1 %v1191_v7  ;;  %1126 = vmatprep.subr.bf16.mxu0 %v1191_v7 }
   0xe   :  { %62 = vperm.xlu0 %1172, %v26_v21   ;;  %1016 = vmatmul.mubr.f32.vlgmr.msra.gmra.mrb[0].mxu1 %v1193_v20 }
   0xf   :  { %1122 = vmatpush3.bf16.msra.mxu1 %v1252_v12  ;;  %1026 = vmatprep.mubr.msk.f32.mxu1 %vm1192_vm0, %v1193_v20 }
  0x10   :  { %1123 = vmatprep.subr.bf16.mxu1 %v1191_v7  ;;  %65 = vperm.xlu1 %1173, %v27_v40  }
  0x13   :  { %1125 = vmatpush3.bf16.msra.mxu1 %v1270_v19 }
  0x14   :  { %1132 = vmatprep.subr.bf16.mxu1 %v1191_v7 }
  0x81   :  { %v45_v24 = vpop.permute.xlu0 %44  ;;  %v51_v25 = vpop.permute.xlu1 %50 }
  0x82   :  { %vm67_vm2 = vcmp.eq.s32.totalorder %v45_v24, %v42_v23  ;;  %vm69_vm3 = vcmp.eq.s32.totalorder %v51_v25, %v42_v23  ;;  %v928_v24 = vld [vmem:[%s1378_s4] ss:$0 sm:$0xff] }
  0x83   :  { %v905_v26 = vsel %vm67_vm2, 1.0, %v1193_v20  ;;  %v907_v29 = vsel %vm69_vm3, 1.0, %v1193_v20 }
  0x84   :  { %995 = vmatprep.mubr.msk.f32.mxu0 %vm91_vm1, %v905_v26 }
  0x85   :  { %v48_v27 = vpop.permute.xlu0 %47  ;;  %v54_v28 = vpop.permute.xlu1 %53 }
  0x86   :  { %vm68_vm4 = vcmp.eq.s32.totalorder %v48_v27, %v42_v23  ;;  %vm70_vm5 = vcmp.eq.s32.totalorder %v54_v28, %v42_v23 }
  0x87   :  { %v906_v30 = vsel %vm68_vm4, 1.0, %v1193_v20  ;;  %v908_v31 = vsel %vm70_vm5, 1.0, %v1193_v20 }
  0x88   :  { %996 = vmatmul.mubr.msk.f32.vlgmr.msra.gmra.mrb[0].mxu0 %vm91_vm1, %v906_v30 }
  0x89   :  { %v57_v32 = vpop.permute.xlu0 %56  ;;  %998 = vmatprep.mubr.msk.f32.mxu0 %vm91_vm1, %v907_v29  ;;  %v60_v33 = vpop.permute.xlu1 %59  ;;  %1128 = vmatpush3.bf16.msra.mxu0 %v1252_v12 }
  0x8a   :  { %vm71_vm6 = vcmp.eq.s32.totalorder %v57_v32, %v42_v23  ;;  %vm72_vm7 = vcmp.eq.s32.totalorder %v60_v33, %v42_v23  ;;  %1129 = vmatprep.subr.bf16.mxu0 %v1191_v7 }
  0x8b   :  { %v909_v34 = vsel %vm71_vm6, 1.0, %v1193_v20  ;;  %v910_v35 = vsel %vm72_vm7, 1.0, %v1193_v20 }
  0x8c   :  { %999 = vmatmul.mubr.msk.f32.gmra.mrb[2].mxu0 %vm91_vm1, %v908_v31 }
  0x8d   :  { %1001 = vmatprep.mubr.msk.f32.mxu0 %vm91_vm1, %v909_v34  ;;  %v63_v36 = vpop.permute.xlu0 %62  ;;  %1131 = vmatpush3.bf16.msra.mxu0 %v1270_v19 }
  0x8e   :  { %vm73_vm8 = vcmp.eq.s32.totalorder %v63_v36, %v42_v23  ;;  %1138 = vmatprep.subr.bf16.mxu0 %v1191_v7 }
  0x8f   :  { %v911_v37 = vsel %vm73_vm8, 1.0, %v1193_v20  ;;  %v66_v45 = vpop.permute.xlu1 %65 }
  0x90   :  { %1002 = vmatmul.mubr.msk.f32.gmra.mrb[4].mxu0 %vm91_vm1, %v910_v35  ;;  %vm74_vm9 = vcmp.eq.s32.totalorder %v66_v45, %v42_v23 }
  0x91   :  { %1004 = vmatprep.mubr.msk.f32.mxu0 %vm91_vm1, %v911_v37  ;;  %v912_v46 = vsel %vm74_vm9, 1.0, %v1193_v20 }
  0x94   :  { %1005 = vmatmul.mubr.msk.f32.gmra.mrb[6].mxu0 %vm91_vm1, %v912_v46 }
  0x95   :  { %1037 = vmatprep.mubr.msk.f32.mxu0 %vm1192_vm0, %v1193_v20 }
  0xe1   :  { %v290_v38 = vpop.f32.mrb[0].mxu1 }
  0xe2   :  { %v1017_v39 = vpop.f32.mrb[1].mxu1 }
 0x15b   :  { %v997_v41 = vpop.f32.mrb[0].mxu0 }
 0x15c   :  { %v182_v42 = vpop.f32.mrb[1].mxu0 }
 0x15d   :  { %v294_v43 = vadd.f32 %v290_v38, %v182_v42 }
 0x15f   :  { %1174 = vtanh.f32 %v294_v43  ;;  %v1000_v47 = vpop.f32.mrb[2].mxu0 }
 0x160   :  { %v192_v48 = vpop.f32.mrb[3].mxu0 }
 0x163   :  { %v1003_v49 = vpop.f32.mrb[4].mxu0 }
 0x164   :  { %v202_v50 = vpop.f32.mrb[5].mxu0 }
 0x167   :  { %v1320_v54 = vpop.f32.mrb[6].mxu0 }
 0x168   :  { %v212_v55 = vpop.f32.mrb[7].mxu0 }
 0x169   :  { %v1175_v44 = vpop.eup %1174 }
 0x16a   :  { %1027 = vmatmul.mubr.msk.f32.vlgmr.msra.gmra.mrb[2].mxu1 %vm91_vm1, %v1175_v44 }
 0x16b   :  { %1134 = vmatpush3.bf16.msra.mxu1 %v1252_v12  ;;  %1048 = vmatprep.mubr.msk.f32.mxu1 %vm1192_vm0, %v1193_v20 }
 0x16c   :  { %1135 = vmatprep.subr.bf16.mxu1 %v1191_v7 }
 0x16f   :  { %1137 = vmatpush3.bf16.msra.mxu1 %v1270_v19 }
 0x170   :  { %1144 = vmatprep.subr.bf16.mxu1 %v1191_v7 }
 0x23d   :  { %v365_v51 = vpop.f32.mrb[2].mxu1 }
 0x23e   :  { %v369_v52 = vadd.f32 %v997_v41, %v365_v51  ;;  %v1028_v53 = vpop.f32.mrb[3].mxu1 }
 0x240   :  { %1176 = vtanh.f32 %v369_v52 }
 0x24a   :  { %v1177_v56 = vpop.eup %1176 }
 0x24b   :  { %1038 = vmatmul.mubr.msk.f32.vlgmr.msra.gmra.mrb[8].mxu0 %vm91_vm1, %v1177_v56 }
 0x24c   :  { %1140 = vmatpush3.bf16.msra.mxu0 %v1252_v12  ;;  %1059 = vmatprep.mubr.msk.f32.mxu0 %vm1192_vm0, %v1193_v20 }
 0x24d   :  { %1141 = vmatprep.subr.bf16.mxu0 %v1191_v7 }
 0x250   :  { %1143 = vmatpush3.bf16.msra.mxu0 %v1270_v19 }
 0x251   :  { %1150 = vmatprep.subr.bf16.mxu0 %v1191_v7 }
 0x31e   :  { %v440_v57 = vpop.f32.mrb[8].mxu0 }
 0x31f   :  { %v444_v58 = vadd.f32 %v440_v57, %v192_v48  ;;  %v1039_v59 = vpop.f32.mrb[9].mxu0 }
 0x321   :  { %1178 = vtanh.f32 %v444_v58 }
 0x32b   :  { %v1179_v60 = vpop.eup %1178 }
 0x32c   :  { %1049 = vmatmul.mubr.msk.f32.vlgmr.msra.gmra.mrb[4].mxu1 %vm91_vm1, %v1179_v60 }
 0x32d   :  { %1146 = vmatpush3.bf16.msra.mxu1 %v1252_v12  ;;  %1070 = vmatprep.mubr.msk.f32.mxu1 %vm1192_vm0, %v1193_v20 }
 0x32e   :  { %1147 = vmatprep.subr.bf16.mxu1 %v1191_v7 }
 0x331   :  { %1149 = vmatpush3.bf16.msra.mxu1 %v1270_v19 }
 0x332   :  { %1156 = vmatprep.subr.bf16.mxu1 %v1191_v7 }
 0x3ff   :  { %v515_v61 = vpop.f32.mrb[4].mxu1 }
 0x400   :  { %v519_v62 = vadd.f32 %v1000_v47, %v515_v61  ;;  %v1050_v63 = vpop.f32.mrb[5].mxu1 }
 0x402   :  { %1180 = vtanh.f32 %v519_v62 }
 0x40c   :  { %v1181_v0 = vpop.eup %1180 }
 0x40d   :  { %1060 = vmatmul.mubr.msk.f32.vlgmr.msra.gmra.mrb[10].mxu0 %vm91_vm1, %v1181_v0 }
 0x40e   :  { %1152 = vmatpush3.bf16.msra.mxu0 %v1252_v12  ;;  %1081 = vmatprep.mubr.msk.f32.mxu0 %vm1192_vm0, %v1193_v20 }
 0x40f   :  { %1153 = vmatprep.subr.bf16.mxu0 %v1191_v7 }
 0x412   :  { %1155 = vmatpush3.bf16.msra.mxu0 %v1270_v19 }
 0x413   :  { %1162 = vmatprep.subr.bf16.mxu0 %v1191_v7 }
 0x4e0   :  { %v590_v1 = vpop.f32.mrb[10].mxu0 }
 0x4e1   :  { %v594_v2 = vadd.f32 %v590_v1, %v202_v50  ;;  %v1061_v3 = vpop.f32.mrb[11].mxu0 }
 0x4e3   :  { %1182 = vtanh.f32 %v594_v2 }
 0x4ed   :  { %v1183_v4 = vpop.eup %1182 }
 0x4ee   :  { %1071 = vmatmul.mubr.msk.f32.vlgmr.msra.gmra.mrb[6].mxu1 %vm91_vm1, %v1183_v4 }
 0x4ef   :  { %1158 = vmatpush3.bf16.msra.mxu1 %v1252_v12  ;;  %1092 = vmatprep.mubr.msk.f32.mxu1 %vm1192_vm0, %v1193_v20 }
 0x4f0   :  { %1159 = vmatprep.subr.bf16.mxu1 %v1191_v7 }
 0x4f3   :  { %1161 = vmatpush3.bf16.msra.mxu1 %v1270_v19  ;;  %v1166_v19 = vpack.c.bf16 %v39_v18, %v38_v16 }
 0x5c1   :  { %v665_v5 = vpop.f32.mrb[6].mxu1 }
 0x5c2   :  { %v669_v6 = vadd.f32 %v1003_v49, %v665_v5  ;;  %v1072_v8 = vpop.f32.mrb[7].mxu1 }
 0x5c4   :  { %1184 = vtanh.f32 %v669_v6 }
 0x5ce   :  { %v1185_v9 = vpop.eup %1184 }
 0x5cf   :  { %1082 = vmatmul.mubr.msk.f32.vlgmr.msra.gmra.mrb[12].mxu0 %vm91_vm1, %v1185_v9 }
 0x5d0   :  { %1103 = vmatprep.mubr.msk.f32.mxu0 %vm1192_vm0, %v1193_v20  ;;  %1164 = vmatpush3.bf16.msra.mxu0 %v1163_v17 }
 0x5d1   :  { %1165 = vmatprep.subr.bf16.mxu0 %v1191_v7 }
 0x5d4   :  { %1167 = vmatpush3.bf16.msra.mxu0 %v1166_v19 }
 0x6a2   :  { %v740_v10 = vpop.f32.mrb[12].mxu0 }
 0x6a3   :  { %v744_v11 = vadd.f32 %v740_v10, %v212_v55  ;;  %v1083_v12 = vpop.f32.mrb[13].mxu0 }
 0x6a5   :  { %1186 = vtanh.f32 %v744_v11 }
 0x6af   :  { %v1187_v13 = vpop.eup %1186 }
 0x6b0   :  { %1093 = vmatmul.mubr.msk.f32.vlgmr.msra.gmra.mrb[8].mxu1 %vm91_vm1, %v1187_v13 }
 0x783   :  { %v815_v20 = vpop.f32.mrb[8].mxu1 }
 0x784   :  { %v819_v21 = vadd.f32 %v1320_v54, %v815_v20  ;;  %v1094_v22 = vpop.f32.mrb[9].mxu1 }
 0x786   :  { %1188 = vtanh.f32 %v819_v21 }
 0x790   :  { %v1189_v23 = vpop.eup %1188 }
 0x791   :  { %1104 = vmatmul.mubr.msk.f32.vlgmr.msra.gmra.mrb[14].mxu0 %vm91_vm1, %v1189_v23 }
 0x864   :  { %v896_v25 = vpop.f32.mrb[14].mxu0 }
 0x865   :  { %v897_v26 = vadd.f32 %v928_v24, %v896_v25  ;;  %v1105_v27 = vpop.f32.mrb[15].mxu0 }
 0x867   :  { %900 = vst [vmem:[%s1379_s5] sm:$0xff] %v897_v26 }

</bundles_post_ra>
